<compile_context>
chip_gen: v6e
topology: v6e:2x2x1
jax: 0.10.0
libtpu: 0.0.40
codegen_flags: <defaults>
</compile_context>

<pallas_src>
import functools

import jax
import jax.numpy as jnp
from jax.experimental import pallas as pl
from jax.experimental.pallas import tpu as pltpu


def _round_up(a: int, b: int) -> int:
    return (a + b - 1) // b * b


def _cdiv(a: int, b: int) -> int:
    return -(-a // b)


def _vmem_budget_bytes() -> int:
    # Per-generation VMEM budget: ~75% of physical VMEM, capped at 100 MiB.
    #   v5e / v6e : 128 MiB physical -> ~96 MiB budget
    #   v7x       :  64 MiB physical -> ~48 MiB budget
    try:
        cap = pltpu.get_tpu_info().vmem_capacity_bytes
    except Exception:
        cap = 64 << 20
    return min(int(cap) * 3 // 4, 100 << 20)


# ---------------------------------------------------------------------------
# Kernels
# ---------------------------------------------------------------------------
def _linear_fused_kernel(x_ref, w_ref, b_ref, o_ref, *, compute_dtype):
    # Fast path (single K block): x_ref (TB, Kp), w_ref (Kp, Np) resident,
    # b_ref (1, Np) resident, o_ref (TB, Np).  One MXU dot, bias add, store.
    x = x_ref[...]
    w = w_ref[...]
    if compute_dtype is not None:
        x = x.astype(compute_dtype)
        w = w.astype(compute_dtype)
    acc = jnp.dot(x, w, preferred_element_type=jnp.float32)
    o_ref[...] = (acc + b_ref[...].astype(jnp.float32)).astype(o_ref.dtype)


def _linear_ktiled_kernel(x_ref, w_ref, b_ref, o_ref, acc_ref, *,
                          tk, w_resident, compute_dtype):
    # K-tiled path: grid = (batch tiles, K tiles).  acc_ref is an f32 VMEM scratch
    # resident across the K axis (output block index constant along K).
    k = pl.program_id(1)

    @pl.when(k == 0)
    def _():
        acc_ref[...] = jnp.zeros_like(acc_ref)

    x = x_ref[...]
    if w_resident:
        # Whole (Kp, Np) weight lives in VMEM (DMA'd once); slice the K chunk in-kernel.
        start = pl.multiple_of(k * tk, tk)
        w = w_ref[pl.ds(start, tk), :]
    else:
        # Weight streamed as (tk, Np) tiles by the BlockSpec pipeline.
        w = w_ref[...]
    if compute_dtype is not None:
        x = x.astype(compute_dtype)
        w = w.astype(compute_dtype)

    acc_ref[...] += jnp.dot(x, w, preferred_element_type=jnp.float32)

    @pl.when(k == pl.num_programs(1) - 1)
    def _():
        o_ref[...] = (acc_ref[...] + b_ref[...].astype(jnp.float32)).astype(o_ref.dtype)


# ---------------------------------------------------------------------------
# Wrapper
# ---------------------------------------------------------------------------
def classifier_forward(x, weight, bias, *, tb=None, tk=None, compute_dtype=None,
                       force_k_tiling=False, w_resident=None):
    """y = x @ weight.T + bias  (torch.nn.Linear semantics).

    x:      (B, dim)
    weight: (n_way, dim)   -- PyTorch Linear weight layout
    bias:   (n_way,)
    returns (B, n_way)

    compute_dtype: optional (e.g. jnp.bfloat16) operand cast inside the kernel
                   (f32 accumulation).  Numerics knob, not a free win.
    force_k_tiling / w_resident / tb / tk: tuning & test overrides (None = auto).
    """
    B, dim = x.shape
    n_way, dim_w = weight.shape
    assert dim_w == dim, "weight must be (n_way, dim)"
    out_dtype = x.dtype

    xi = jnp.dtype(x.dtype).itemsize
    wi = jnp.dtype(weight.dtype).itemsize
    bi = jnp.dtype(bias.dtype).itemsize
    oi = jnp.dtype(out_dtype).itemsize

    budget = _vmem_budget_bytes()

    # ---- class (N) padding: lane-dense; 256-multiples for big heads (v6e/v7x MXU cols) ----
    n_mult = 256 if n_way > 128 else 128
    n_pad = _round_up(n_way, n_mult)

    # ---- batch tile selection ----
    if tb is None:
        n_blk = _cdiv(B, 512)
        tb_sel = _round_up(_cdiv(B, n_blk), 8)
        # v7x megacore: give the second TensorCore work on the "parallel" batch axis.
        if n_blk < 2 and B >= 16:
            tb_sel = _round_up(_cdiv(B, 2), 8)
    else:
        tb_sel = max(8, _round_up(min(tb, _round_up(B, 8)), 8))
    b_pad = _round_up(B, tb_sel)

    k_pad128 = _round_up(dim, 128)

    def _fast_bytes(tb_):
        # double-buffered x / out tiles + (conservatively 2x-buffered) resident W + bias
        return (2 * tb_ * k_pad128 * xi + 2 * k_pad128 * n_pad * wi
                + 2 * n_pad * bi + 2 * tb_ * n_pad * oi)

    use_fast = (not force_k_tiling) and (_fast_bytes(tb_sel) <= budget)

    # ---- wrapper-side layout prep: W pre-transposed to (K, N), everything zero-padded ----
    w_t = weight.T                      # (dim, n_way): K on sublanes, N on lanes
    b_row = bias.reshape(1, n_way)

    if use_fast:
        k_pad = k_pad128
        tk_sel = k_pad
        w_res = True
        est_bytes = _fast_bytes(tb_sel)
    else:
        tk_sel = min(2048, k_pad128) if tk is None else min(_round_up(max(tk, 128), 128),
                                                            _round_up(k_pad128, 128))
        tk_sel = max(128, tk_sel)
        while True:
            k_pad = _round_up(dim, tk_sel)
            w_res = ((2 * k_pad * n_pad * wi) <= budget // 2) if w_resident is None \
                else bool(w_resident)
            w_bytes = 2 * (k_pad if w_res else tk_sel) * n_pad * wi
            est_bytes = (2 * tb_sel * tk_sel * xi + w_bytes + 2 * n_pad * bi
                         + 2 * tb_sel * n_pad * oi + tb_sel * n_pad * 4)
            if est_bytes <= budget or (tk_sel <= 128 and tb_sel <= 8):
                break
            if tk_sel > 128:
                tk_sel = max(128, _round_up(tk_sel // 2, 128))
            else:
                tb_sel = max(8, _round_up(tb_sel // 2, 8))
                b_pad = _round_up(B, tb_sel)

    # ---- zero padding (benign for matmul + bias; output sliced back below) ----
    x_p = x if (b_pad, k_pad) == (B, dim) else \
        jnp.pad(x, ((0, b_pad - B), (0, k_pad - dim)))
    w_p = w_t if (k_pad, n_pad) == (dim, n_way) else \
        jnp.pad(w_t, ((0, k_pad - dim), (0, n_pad - n_way)))
    b_p = b_row if n_pad == n_way else jnp.pad(b_row, ((0, 0), (0, n_pad - n_way)))

    vmem_limit = min(budget, max(est_bytes * 5 // 4, 16 << 20))

    if use_fast:
        cost = pl.CostEstimate(
            flops=2 * B * dim * n_way, transcendentals=0,
            bytes_accessed=(b_pad * k_pad * xi + k_pad * n_pad * wi
                            + n_pad * bi + b_pad * n_pad * oi))
        out_p = pl.pallas_call(
            functools.partial(_linear_fused_kernel, compute_dtype=compute_dtype),
            out_shape=jax.ShapeDtypeStruct((b_pad, n_pad), out_dtype),
            grid_spec=pltpu.PrefetchScalarGridSpec(
                num_scalar_prefetch=0,
                grid=(b_pad // tb_sel,),
                in_specs=[
                    pl.BlockSpec((tb_sel, k_pad), lambda i: (i, 0)),   # x (pipelined)
                    pl.BlockSpec((k_pad, n_pad), lambda i: (0, 0)),    # W resident (1 DMA)
                    pl.BlockSpec((1, n_pad), lambda i: (0, 0)),        # bias resident
                ],
                out_specs=pl.BlockSpec((tb_sel, n_pad), lambda i: (i, 0)),
            ),
            compiler_params=pltpu.CompilerParams(
                dimension_semantics=("parallel",),
                vmem_limit_bytes=vmem_limit),
            cost_estimate=cost,
        )(x_p, w_p, b_p)
    else:
        n_i = b_pad // tb_sel
        n_k = k_pad // tk_sel
        w_traffic = k_pad * n_pad * wi * (1 if w_res else n_i)
        cost = pl.CostEstimate(
            flops=2 * B * dim * n_way, transcendentals=0,
            bytes_accessed=(b_pad * k_pad * xi + w_traffic
                            + n_pad * bi + b_pad * n_pad * oi))
        if w_res:
            w_spec = pl.BlockSpec((k_pad, n_pad), lambda i, k: (0, 0))   # resident, sliced in-kernel
        else:
            w_spec = pl.BlockSpec((tk_sel, n_pad), lambda i, k: (k, 0))  # streamed K tiles
        out_p = pl.pallas_call(
            functools.partial(_linear_ktiled_kernel, tk=tk_sel,
                              w_resident=w_res, compute_dtype=compute_dtype),
            out_shape=jax.ShapeDtypeStruct((b_pad, n_pad), out_dtype),
            grid_spec=pltpu.PrefetchScalarGridSpec(
                num_scalar_prefetch=0,
                grid=(n_i, n_k),
                in_specs=[
                    pl.BlockSpec((tb_sel, tk_sel), lambda i, k: (i, k)),  # x tile
                    w_spec,
                    pl.BlockSpec((1, n_pad), lambda i, k: (0, 0)),        # bias resident
                ],
                out_specs=pl.BlockSpec((tb_sel, n_pad), lambda i, k: (i, 0)),
                scratch_shapes=[pltpu.VMEM((tb_sel, n_pad), jnp.float32)],
            ),
            compiler_params=pltpu.CompilerParams(
                dimension_semantics=("parallel", "arbitrary"),
                vmem_limit_bytes=vmem_limit),
            cost_estimate=cost,
        )(x_p, w_p, b_p)

    return out_p[:B, :n_way]


# ---------------------------------------------------------------------------
# Self-test
# ---------------------------------------------------------------------------
if __name__ == "__main__":
    key = jax.random.PRNGKey(0)

    # --- Case 1: shapes implied by the module -> fused single-dot fast path ---
    B, dim, n_way = 8, 32, 8
    kx, kw, kb = jax.random.split(key, 3)
    bound = float(dim) ** -0.5
    x = jax.random.normal(kx, (B, dim), dtype=jnp.float32)
    w = jax.random.uniform(kw, (n_way, dim), jnp.float32, minval=-bound, maxval=bound)
    b = jax.random.uniform(kb, (n_way,), jnp.float32, minval=-bound, maxval=bound)

    y = classifier_forward(x, w, b)
    jax.block_until_ready(y)
    y_ref = x @ w.T + b
    assert y.shape == (B, n_way)
    assert jnp.allclose(y, y_ref, atol=1e-4, rtol=1e-4), "case 1 mismatch vs reference"

    # bf16-compute numerics knob (f32 accumulation), looser tolerance
    y_bf = classifier_forward(x, w, b, compute_dtype=jnp.bfloat16)
    jax.block_until_ready(y_bf)
    assert jnp.allclose(y_bf, y_ref, atol=5e-2, rtol=5e-2), "case 1 bf16 mismatch"

    # --- Case 2: K-tiled path, resident weight sliced in-kernel (grid (2, 3)),
    #             exercises batch padding, class padding and accumulator phases ---
    B2, dim2, n_way2 = 24, 384, 10
    kx2, kw2, kb2 = jax.random.split(jax.random.PRNGKey(1), 3)
    bound2 = float(dim2) ** -0.5
    x2 = jax.random.normal(kx2, (B2, dim2), dtype=jnp.float32)
    w2 = jax.random.uniform(kw2, (n_way2, dim2), jnp.float32, minval=-bound2, maxval=bound2)
    b2 = jax.random.uniform(kb2, (n_way2,), jnp.float32, minval=-bound2, maxval=bound2)

    y2 = classifier_forward(x2, w2, b2, tk=128, force_k_tiling=True)
    jax.block_until_ready(y2)
    y2_ref = x2 @ w2.T + b2
    assert y2.shape == (B2, n_way2)
    assert jnp.allclose(y2, y2_ref, atol=1e-4, rtol=1e-4), "case 2 mismatch vs reference"

    # --- Case 3: K-tiled path with streamed weight tiles (huge-weight fallback) ---
    B3, dim3, n_way3 = 16, 256, 8
    kx3, kw3, kb3 = jax.random.split(jax.random.PRNGKey(2), 3)
    bound3 = float(dim3) ** -0.5
    x3 = jax.random.normal(kx3, (B3, dim3), dtype=jnp.float32)
    w3 = jax.random.uniform(kw3, (n_way3, dim3), jnp.float32, minval=-bound3, maxval=bound3)
    b3 = jax.random.uniform(kb3, (n_way3,), jnp.float32, minval=-bound3, maxval=bound3)

    y3 = classifier_forward(x3, w3, b3, tk=128, force_k_tiling=True, w_resident=False)
    jax.block_until_ready(y3)
    y3_ref = x3 @ w3.T + b3
    assert jnp.allclose(y3, y3_ref, atol=1e-4, rtol=1e-4), "case 3 mismatch vs reference"

    print("KERNEL_OK")
</pallas_src>

<mosaic_0001>
module attributes {stable_mosaic.version = 11 : i64} {
  func.func @_linear_fused_kernel(%arg0: i32, %arg1: memref<8x128xf32, #tpu.memory_space<vmem>>, %arg2: memref<128x128xf32, #tpu.memory_space<vmem>>, %arg3: memref<1x128xf32, #tpu.memory_space<vmem>>, %arg4: memref<8x128xf32, #tpu.memory_space<vmem>>) attributes {dimension_semantics = [#tpu.dimension_semantics<parallel>], iteration_bounds = array<i64: 1>, scalar_prefetch = 0 : i64, scratch_operands = 0 : i64, tpu.core_type = #tpu.core_type<tc>, window_params = [{transform_indices = @transform_0, window_bounds = array<i64: 8, 128>}, {pipeline_mode = #tpu.pipeline_mode<synchronous>, transform_indices = @transform_1, window_bounds = array<i64: 128, 128>}, {pipeline_mode = #tpu.pipeline_mode<synchronous>, transform_indices = @transform_2, window_bounds = array<i64: 1, 128>}, {transform_indices = @transform_3, window_bounds = array<i64: 8, 128>}]} {
    %c0 = arith.constant 0 : index
    %c0_0 = arith.constant 0 : index
    %0 = vector.load %arg1[%c0, %c0_0] : memref<8x128xf32, #tpu.memory_space<vmem>>, vector<8x128xf32>
    %c0_1 = arith.constant 0 : index
    %c0_2 = arith.constant 0 : index
    %1 = vector.load %arg2[%c0_1, %c0_2] : memref<128x128xf32, #tpu.memory_space<vmem>>, vector<128x128xf32>
    %cst = arith.constant dense<0.000000e+00> : vector<8x128xf32>
    %2 = tpu.matmul %0, %1, %cst {dimension_numbers = #tpu.dot_dimension_numbers<[1], [0], [0], [1], [0, 0, 1, 1], [], []>} : vector<8x128xf32>, vector<128x128xf32>, vector<8x128xf32> -> vector<8x128xf32>
    %c0_3 = arith.constant 0 : index
    %c0_4 = arith.constant 0 : index
    %3 = vector.load %arg3[%c0_3, %c0_4] : memref<1x128xf32, #tpu.memory_space<vmem>>, vector<1x128xf32>
    %4 = vector.broadcast %3 : vector<1x128xf32> to vector<8x128xf32>
    %5 = arith.addf %2, %4 : vector<8x128xf32>
    %c0_5 = arith.constant 0 : index
    %c0_6 = arith.constant 0 : index
    %6 = vector.load %arg4[%c0_5, %c0_6] : memref<8x128xf32, #tpu.memory_space<vmem>>, vector<8x128xf32>
    tpu.vector_store %arg4[%c0_5, %c0_6], %5 {strides = array<i32>} : memref<8x128xf32, #tpu.memory_space<vmem>>, vector<8x128xf32>,
    return
  }
  func.func @transform_0(%arg0: i32) -> (i32, i32) {
    %c0_i32 = arith.constant 0 : i32
    %c0_i32_0 = arith.constant 0 : i32
    return %arg0, %c0_i32 : i32, i32
  }
  func.func @transform_1(%arg0: i32) -> (i32, i32) {
    %c0_i32 = arith.constant 0 : i32
    %c0_i32_0 = arith.constant 0 : i32
    %c0_i32_1 = arith.constant 0 : i32
    return %c0_i32, %c0_i32_0 : i32, i32
  }
  func.func @transform_2(%arg0: i32) -> (i32, i32) {
    %c0_i32 = arith.constant 0 : i32
    %c0_i32_0 = arith.constant 0 : i32
    %c0_i32_1 = arith.constant 0 : i32
    return %c0_i32, %c0_i32_0 : i32, i32
  }
  func.func @transform_3(%arg0: i32) -> (i32, i32) {
    %c0_i32 = arith.constant 0 : i32
    %c0_i32_0 = arith.constant 0 : i32
    return %arg0, %c0_i32 : i32, i32
  }
}

</mosaic_0001>

<bundles_post_ra>
// kernel: tpu_custom_call.1
= control target key start
LH: loop header
LB: loop body
LE: loop exit
PB: predicated region body
PF: predicated region fallthrough
CT: control target
= control target key end

     0   :  { %8 = vsyncpa [#allocation3], 0  ;;  %s317_s0 = inlined_call_operand.hbm [shape: f32[8,128], index: 0, kind: input, shape index: {}]   ;;  %s318_s1 = inlined_call_operand.hbm [shape: f32[128,128], index: 1, kind: input, shape index: {}]   ;;  %s319_s2 = inlined_call_operand.vmem [shape: f32[1,128], index: 2, kind: input, shape index: {}]   ;;  %s320_s3 = inlined_call_operand.hbm [shape: f32[8,128], index: 3, kind: output, shape index: {}]  }
   0x1   :  { %9 = vsyncpa [#allocation6], 0 }
   0x2   :  { %10 = vsyncpa [#allocation4], 0  ;;  %s278_s12 = smov [#allocation2]   ;;  %s279_s14 = smov [#allocation5]  }
   0x3   :  { %s17_s13 = sshll.u32 %s278_s12, 4  ;;  %s26_s15 = sshll.u32 %s279_s14, 4  ;;  %s18_s13 = int_to_ptr.vmem [resolvable:$true] %s17_s13  ;;  %s27_s15 = int_to_ptr.vmem [resolvable:$true] %s26_s15 }
   0x4   :  { %s220_s16 = scalar_lea.vmem %s18_s13, 128  ;;  %p225_p1 = scmp.lt.s32.totalorder %s18_s13, %s18_s13 }
   0x5   :  { %p221_p0 = scmp.ne.s32.totalorder %s18_s13, %s220_s16  ;;  %p226_p2 = scmp.lt.s32.totalorder %s220_s16, %s220_s16 }
   0x7   :  { %p227_p3 = por %p226_p2, %p225_p1 }
   0x9   :  { %p228_p4 = pnand %p227_p3, %p221_p0 }
   0xb   :  { %231 = shalt.err (!%p228_p4)
}
   0xc   :  { %20 = dma.hbm_to_vmem [thread:$0]  %s317_s0, 128, %s18_s13, [#allocation3]  }
   0xd   :  { %s240_s19 = scalar_lea.vmem %s27_s15, 2048  ;;  %p245_p6 = scmp.lt.s32.totalorder %s27_s15, %s27_s15 }
   0xe   :  { %p241_p5 = scmp.ne.s32.totalorder %s27_s15, %s240_s19  ;;  %p246_p7 = scmp.lt.s32.totalorder %s240_s19, %s240_s19 }
  0x10   :  { %p247_p8 = por %p246_p7, %p245_p6 }
  0x12   :  { %p248_p9 = pnand %p247_p8, %p241_p5 }
  0x14   :  { %251 = shalt.err (!%p248_p9)
}
  0x15   :  { %s280_s20 = smov 128   ;;  %s281_s21 = smov 8  }
  0x16   :  { %32 = dma.hbm_to_vmem [thread:$0]  %s318_s1, 2048, %s27_s15, [#allocation6], %s280_s20, %s280_s20, %s281_s21  }
  0x17   :  { %272 = dma.done.wait [#allocation3], 128  }
  0x18   :  { %273 = vsyncadd [#allocation3], 4294967168 }
  0x19   :  { %274 = dma.done.wait [#allocation6], 2048  }
  0x1a   :  { %275 = vsyncadd [#allocation6], 4294965248  ;;  %v282_v0 = vmov 0.0   ;;  %vm283_vm0 = vmmov 0   ;;  %v57_v1 = vld [vmem:[#allocation5 + $0x78] sm:$0xff]  ;;  %v56_v2 = vld [vmem:[#allocation5 + $0x70] sm:$0xff] }
  0x1b   :  { %170 = vmatprep.subr.mxu0 %v282_v0  ;;  %202 = vmatprep.mubr.msk.f32.mxu0 %vm283_vm0, %v282_v0  ;;  %v55_v3 = vld [vmem:[#allocation5 + $0x68] sm:$0xff]  ;;  %v54_v4 = vld [vmem:[#allocation5 + $0x60] sm:$0xff]  ;;  %v53_v5 = vld [vmem:[#allocation5 + $0x58] sm:$0xff]  ;;  %s284_s24 = smov [#allocation7]  }
  0x1c   :  { %171 = vmatpush3.msra.mxu0 %v57_v1  ;;  %v52_v6 = vld [vmem:[#allocation5 + $0x50] sm:$0xff]  ;;  %v51_v7 = vld [vmem:[#allocation5 + $0x48] sm:$0xff]  ;;  %v50_v8 = vld [vmem:[#allocation5 + $0x40] sm:$0xff]  ;;  %s142_s25 = sshll.u32 %s284_s24, 4  ;;  %s143_s25 = int_to_ptr.vmem [resolvable:$true] %s142_s25 }
  0x1d   :  { %172 = vmatprep.subr.mxu0 %v282_v0  ;;  %v49_v9 = vld [vmem:[#allocation5 + $0x38] sm:$0xff]  ;;  %v48_v10 = vld [vmem:[#allocation5 + $0x30] sm:$0xff]  ;;  %v47_v11 = vld [vmem:[#allocation5 + $0x28] sm:$0xff]  ;;  %s252_s26 = scalar_lea.vmem %s143_s25, 128  ;;  %p257_p11 = scmp.lt.s32.totalorder %s143_s25, %s143_s25 }
  0x1e   :  { %173 = vmatpush3.msra.mxu0 %v56_v2  ;;  %v46_v12 = vld [vmem:[#allocation5 + $0x20] sm:$0xff]  ;;  %v45_v13 = vld [vmem:[#allocation5 + $0x18] sm:$0xff]  ;;  %v44_v14 = vld [vmem:[#allocation5 + $0x10] sm:$0xff]  ;;  %p253_p10 = scmp.ne.s32.totalorder %s143_s25, %s252_s26  ;;  %p258_p12 = scmp.lt.s32.totalorder %s252_s26, %s252_s26 }
  0x1f   :  { %174 = vmatprep.subr.mxu0 %v282_v0  ;;  %v43_v15 = vld [vmem:[#allocation5 + $0x8] sm:$0xff]  ;;  %v42_v16 = vld [vmem:[#allocation5] sm:$0xff]  ;;  %v41_v17 = vld [vmem:[#allocation2] sm:$0xff] }
  0x20   :  { %175 = vmatpush3.msra.mxu0 %v55_v3  ;;  %v152_v18 = vld [vmem:[%s319_s2] ss:$0 sm:$0xff]  ;;  %p259_p13 = por %p258_p12, %p257_p11 }
  0x21   :  { %176 = vmatprep.subr.mxu0 %v282_v0 }
  0x22   :  { %177 = vmatpush3.msra.mxu0 %v54_v4  ;;  %p260_p0 = pnand %p259_p13, %p253_p10 }
  0x23   :  { %178 = vmatprep.subr.mxu0 %v282_v0 }
  0x24   :  { %179 = vmatpush3.msra.mxu0 %v53_v5 }
  0x25   :  { %180 = vmatprep.subr.mxu0 %v282_v0 }
  0x26   :  { %181 = vmatpush3.msra.mxu0 %v52_v6 }
  0x27   :  { %182 = vmatprep.subr.mxu0 %v282_v0 }
  0x28   :  { %183 = vmatpush3.msra.mxu0 %v51_v7 }
  0x29   :  { %184 = vmatprep.subr.mxu0 %v282_v0 }
  0x2a   :  { %185 = vmatpush3.msra.mxu0 %v50_v8 }
  0x2b   :  { %186 = vmatprep.subr.mxu0 %v282_v0 }
  0x2c   :  { %187 = vmatpush3.msra.mxu0 %v49_v9 }
  0x2d   :  { %188 = vmatprep.subr.mxu0 %v282_v0 }
  0x2e   :  { %189 = vmatpush3.msra.mxu0 %v48_v10 }
  0x2f   :  { %190 = vmatprep.subr.mxu0 %v282_v0 }
  0x30   :  { %191 = vmatpush3.msra.mxu0 %v47_v11 }
  0x31   :  { %192 = vmatprep.subr.mxu0 %v282_v0 }
  0x32   :  { %193 = vmatpush3.msra.mxu0 %v46_v12 }
  0x33   :  { %194 = vmatprep.subr.mxu0 %v282_v0 }
  0x34   :  { %195 = vmatpush3.msra.mxu0 %v45_v13 }
  0x35   :  { %196 = vmatprep.subr.mxu0 %v282_v0 }
  0x36   :  { %197 = vmatpush3.msra.mxu0 %v44_v14 }
  0x37   :  { %198 = vmatprep.subr.mxu0 %v282_v0 }
  0x38   :  { %199 = vmatpush3.msra.mxu0 %v43_v15 }
  0x39   :  { %200 = vmatprep.subr.mxu0 %v282_v0 }
  0x3a   :  { %201 = vmatpush3.msra.mxu0 %v42_v16 }
  0x3b   :  { %203 = vmatmul.mubr.f32.vlgmr.msra.gmra.mxu0 %v41_v17 }
  0xfb   :  { %v131_v19 = vpop.f32.mrf.mxu0 }
  0xfc   :  { %v132_v20 = vadd.f32 %v152_v18, %v131_v19 }
  0xfd   :  { %v204_v21 = vpop.f32.mrf.mxu0 }
  0xfe   :  { %135 = vst [vmem:[#allocation7] sm:$0xff] %v132_v20 }
  0xff   :  { %263 = shalt.err (!%p260_p0)
}
 0x100   :  { %145 = dma.vmem_to_hbm [thread:$0]  %s143_s25, 128, %s320_s3, [#allocation4]  }
 0x101   :  { %276 = dma.done.wait [#allocation4], 128  }
 0x102   :  { %277 = vsyncadd [#allocation4], 4294967168 }
 0x103   :  { %149 = vsyncpa [#allocation3], 1 }
 0x104   :  { %150 = vsyncpa [#allocation6], 1 }
 0x105   :  { %151 = vsyncpa [#allocation4], 1 }

</bundles_post_ra>
